<compile_context>
chip_gen: v6e
topology: v6e:2x2x1
jax: 0.10.0
libtpu: 0.0.40
codegen_flags: <defaults>
</compile_context>

<pallas_src>
import functools

import jax
import jax.numpy as jnp
from jax.experimental import pallas as pl
from jax.experimental.pallas import tpu as pltpu


def _round_up(n, m):
    return (n + m - 1) // m * m


def ffn_kernel(x_ref, w1_ref, b1_ref, w2_ref, b2_ref, o_ref, acc_ref):
    # x_ref:  (tm, Hp)   bf16 row tile of the flattened activations
    # w1_ref: (Hp, ti)   bf16 slab of linear1 weight (transposed)
    # b1_ref: (1, ti)    f32 slab of linear1 bias
    # w2_ref: (ti, Hp)   bf16 slab of linear2 weight (transposed)
    # b2_ref: (1, Hp)    f32 linear2 bias
    # o_ref:  (tm, Hp)   output tile (original dtype)
    # acc_ref:(tm, Hp)   f32 accumulator, resident across the I axis
    ki = pl.program_id(1)

    @pl.when(ki == 0)
    def _():
        # Fold the output bias in exactly once at accumulator init.
        acc_ref[...] = jnp.broadcast_to(b2_ref[...], acc_ref.shape).astype(
            jnp.float32)

    # linear1 slab (MXU, f32 accumulation) + bias + ReLU (VPU, f32).
    h = jnp.dot(x_ref[...], w1_ref[...], preferred_element_type=jnp.float32)
    h = jnp.maximum(h + b1_ref[...], 0.0)

    # linear2 slab, accumulated in f32.
    acc_ref[...] += jnp.dot(h.astype(w2_ref.dtype), w2_ref[...],
                            preferred_element_type=jnp.float32)

    @pl.when(ki == pl.num_programs(1) - 1)
    def _():
        o_ref[...] = acc_ref[...].astype(o_ref.dtype)


def berrrt_ffn(x, w1t, b1, w2t, b2, *, tm=256, ti=512,
               compute_dtype=jnp.bfloat16):
    """x: (batch, seq, hidden) -> (batch, seq, hidden).

    w1t: (hidden, inter)  -- linear1 weight, transposed (PyTorch stores (I,H))
    b1:  (inter,)
    w2t: (inter, hidden)  -- linear2 weight, transposed
    b2:  (hidden,)
    """
    assert tm % 8 == 0, "row tile must be a multiple of 8 (sublane)"
    assert ti % 128 == 0, "intermediate tile must be a multiple of 128 (lane)"

    B, S, H = x.shape
    I = w1t.shape[1]
    M = B * S
    out_dtype = x.dtype

    # Pad to lane/sublane friendly sizes.
    Hp = _round_up(H, 128)
    tm_eff = min(tm, _round_up(M, 8))
    Mp = _round_up(M, tm_eff)
    ti_eff = min(ti, _round_up(I, 128))
    Ip = _round_up(I, ti_eff)

    x2d = jnp.pad(x.reshape(M, H), ((0, Mp - M), (0, Hp - H)))
    w1p = jnp.pad(w1t, ((0, Hp - H), (0, Ip - I)))
    w2p = jnp.pad(w2t, ((0, Ip - I), (0, Hp - H)))
    b1p = jnp.pad(b1, (0, Ip - I)).reshape(1, Ip).astype(jnp.float32)
    b2p = jnp.pad(b2, (0, Hp - H)).reshape(1, Hp).astype(jnp.float32)

    # bf16 matmul inputs, f32 accumulation inside the kernel.
    x2d = x2d.astype(compute_dtype)
    w1p = w1p.astype(compute_dtype)
    w2p = w2p.astype(compute_dtype)

    grid = (Mp // tm_eff, Ip // ti_eff)

    # Rough VMEM budget: double-buffered tiles + accumulator, with headroom.
    cbytes = jnp.dtype(compute_dtype).itemsize
    obytes = jnp.dtype(out_dtype).itemsize
    vmem_needed = (2 * tm_eff * Hp * cbytes        # x tiles
                   + 2 * Hp * ti_eff * cbytes      # W1^T slabs
                   + 2 * ti_eff * Hp * cbytes      # W2^T slabs
                   + 2 * ti_eff * 4 + 2 * Hp * 4   # biases
                   + 2 * tm_eff * Hp * obytes      # output tiles
                   + tm_eff * Hp * 4)              # f32 accumulator
    # Cap at 64 MiB: safe on v7x (64 MiB physical VMEM) and plenty on v5e/v6e.
    vmem_limit = min(2 * vmem_needed + (2 << 20), 64 * 1024 * 1024)

    cost = pl.CostEstimate(
        flops=4 * M * H * I,          # 2*M*H*I per matmul, two matmuls
        transcendentals=0,
        bytes_accessed=(M * H * cbytes + H * I * cbytes + I * H * cbytes
                        + I * 4 + H * 4 + M * H * obytes),
    )

    out2d = pl.pallas_call(
        ffn_kernel,
        out_shape=jax.ShapeDtypeStruct((Mp, Hp), out_dtype),
        grid_spec=pltpu.PrefetchScalarGridSpec(
            num_scalar_prefetch=0,
            grid=grid,
            in_specs=[
                pl.BlockSpec((tm_eff, Hp), lambda i, k: (i, 0)),   # x tile
                pl.BlockSpec((Hp, ti_eff), lambda i, k: (0, k)),   # W1^T slab
                pl.BlockSpec((1, ti_eff), lambda i, k: (0, k)),    # b1 slab
                pl.BlockSpec((ti_eff, Hp), lambda i, k: (k, 0)),   # W2^T slab
                pl.BlockSpec((1, Hp), lambda i, k: (0, 0)),        # b2
            ],
            out_specs=pl.BlockSpec((tm_eff, Hp), lambda i, k: (i, 0)),
            scratch_shapes=[pltpu.VMEM((tm_eff, Hp), jnp.float32)],
        ),
        compiler_params=pltpu.CompilerParams(
            dimension_semantics=("parallel", "arbitrary"),
            vmem_limit_bytes=int(vmem_limit)),
        cost_estimate=cost,
    )(x2d, w1p, b1p, w2p, b2p)

    return out2d[:M, :H].reshape(B, S, H)


def init_params(key, hidden_size, intermediate_size, dtype=jnp.float32):
    """Deterministic nn.Linear-style init (uniform +/- 1/sqrt(fan_in))."""
    k1, k2, k3, k4 = jax.random.split(key, 4)
    bound1 = 1.0 / (hidden_size ** 0.5)
    bound2 = 1.0 / (intermediate_size ** 0.5)
    # PyTorch stores W1 as (inter, hidden); we keep the transposed layout.
    w1t = jax.random.uniform(k1, (hidden_size, intermediate_size),
                             dtype, -bound1, bound1)
    b1 = jax.random.uniform(k2, (intermediate_size,), dtype, -bound1, bound1)
    w2t = jax.random.uniform(k3, (intermediate_size, hidden_size),
                             dtype, -bound2, bound2)
    b2 = jax.random.uniform(k4, (hidden_size,), dtype, -bound2, bound2)
    return w1t, b1, w2t, b2


if __name__ == "__main__":
    # Small, deliberately misaligned shapes (hidden=96, seq=40) so both grid
    # axes AND the padding path are exercised: 2 row tiles x 3 I-slabs.
    batch, seq, hidden, inter = 2, 40, 96, 384

    key = jax.random.PRNGKey(0)
    kx, kp = jax.random.split(key)
    x = jax.random.normal(kx, (batch, seq, hidden), jnp.float32)
    w1t, b1, w2t, b2 = init_params(kp, hidden, inter)

    fn = jax.jit(functools.partial(berrrt_ffn, tm=64, ti=128))
    out = fn(x, w1t, b1, w2t, b2)
    jax.block_until_ready(out)

    # Reference with the same bf16-inputs / f32-accumulation math.
    xb = x.astype(jnp.bfloat16)
    h_ref = jnp.einsum("bsh,hi->bsi", xb, w1t.astype(jnp.bfloat16),
                       preferred_element_type=jnp.float32) + b1
    h_ref = jnp.maximum(h_ref, 0.0)
    ref = jnp.einsum("bsi,ih->bsh", h_ref.astype(jnp.bfloat16),
                     w2t.astype(jnp.bfloat16),
                     preferred_element_type=jnp.float32) + b2

    assert out.shape == (batch, seq, hidden)
    err = float(jnp.max(jnp.abs(out - ref)))
    assert jnp.allclose(out, ref, atol=2e-3, rtol=2e-3), err

    print("KERNEL_OK")
</pallas_src>

<mosaic_0001>
module attributes {stable_mosaic.version = 11 : i64} {
  func.func @ffn_kernel(%arg0: i32, %arg1: i32, %arg2: memref<64x128xbf16, #tpu.memory_space<vmem>>, %arg3: memref<128x128xbf16, #tpu.memory_space<vmem>>, %arg4: memref<1x128xf32, #tpu.memory_space<vmem>>, %arg5: memref<128x128xbf16, #tpu.memory_space<vmem>>, %arg6: memref<1x128xf32, #tpu.memory_space<vmem>>, %arg7: memref<64x128xf32, #tpu.memory_space<vmem>>, %arg8: memref<64x128xf32, #tpu.memory_space<vmem>>) attributes {dimension_semantics = [#tpu.dimension_semantics<parallel>, #tpu.dimension_semantics<arbitrary>], iteration_bounds = array<i64: 2, 3>, scalar_prefetch = 0 : i64, scratch_operands = 1 : i64, tpu.core_type = #tpu.core_type<tc>, window_params = [{transform_indices = @transform_0, window_bounds = array<i64: 64, 128>}, {transform_indices = @transform_1, window_bounds = array<i64: 128, 128>}, {transform_indices = @transform_2, window_bounds = array<i64: 1, 128>}, {transform_indices = @transform_3, window_bounds = array<i64: 128, 128>}, {pipeline_mode = #tpu.pipeline_mode<synchronous>, transform_indices = @transform_4, window_bounds = array<i64: 1, 128>}, {transform_indices = @transform_5, window_bounds = array<i64: 64, 128>}]} {
    %c0_i32 = arith.constant 0 : i32
    %0 = arith.cmpi eq, %arg1, %c0_i32 : i32
    %1 = arith.extui %0 : i1 to i32
    %c0_i32_0 = arith.constant 0 : i32
    %2 = arith.cmpi ne, %1, %c0_i32_0 : i32
    scf.if %2 {
      %c0_15 = arith.constant 0 : index
      %c0_16 = arith.constant 0 : index
      %20 = vector.load %arg6[%c0_15, %c0_16] : memref<1x128xf32, #tpu.memory_space<vmem>>, vector<1x128xf32>
      %21 = vector.shape_cast %20 : vector<1x128xf32> to vector<1x128xf32>
      %22 = vector.broadcast %21 : vector<1x128xf32> to vector<64x128xf32>
      %c0_17 = arith.constant 0 : index
      %c0_18 = arith.constant 0 : index
      %23 = vector.load %arg8[%c0_17, %c0_18] : memref<64x128xf32, #tpu.memory_space<vmem>>, vector<64x128xf32>
      tpu.vector_store %arg8[%c0_17, %c0_18], %22 {strides = array<i32>} : memref<64x128xf32, #tpu.memory_space<vmem>>, vector<64x128xf32>,
    } else {
    }
    %c0 = arith.constant 0 : index
    %c0_1 = arith.constant 0 : index
    %3 = vector.load %arg2[%c0, %c0_1] : memref<64x128xbf16, #tpu.memory_space<vmem>>, vector<64x128xbf16>
    %c0_2 = arith.constant 0 : index
    %c0_3 = arith.constant 0 : index
    %4 = vector.load %arg3[%c0_2, %c0_3] : memref<128x128xbf16, #tpu.memory_space<vmem>>, vector<128x128xbf16>
    %cst = arith.constant dense<0.000000e+00> : vector<64x128xf32>
    %5 = tpu.matmul %3, %4, %cst {dimension_numbers = #tpu.dot_dimension_numbers<[1], [0], [0], [1], [0, 0, 1, 1], [], []>} : vector<64x128xbf16>, vector<128x128xbf16>, vector<64x128xf32> -> vector<64x128xf32>
    %c0_4 = arith.constant 0 : index
    %c0_5 = arith.constant 0 : index
    %6 = vector.load %arg4[%c0_4, %c0_5] : memref<1x128xf32, #tpu.memory_space<vmem>>, vector<1x128xf32>
    %7 = vector.broadcast %6 : vector<1x128xf32> to vector<64x128xf32>
    %8 = arith.addf %5, %7 : vector<64x128xf32>
    %cst_6 = arith.constant 0.000000e+00 : f32
    %9 = vector.broadcast %cst_6 : f32 to vector<64x128xf32>
    %10 = arith.maximumf %8, %9 : vector<64x128xf32>
    %c0_7 = arith.constant 0 : index
    %c0_8 = arith.constant 0 : index
    %11 = vector.load %arg8[%c0_7, %c0_8] : memref<64x128xf32, #tpu.memory_space<vmem>>, vector<64x128xf32>
    %12 = arith.truncf %10 : vector<64x128xf32> to vector<64x128xbf16>
    %c0_9 = arith.constant 0 : index
    %c0_10 = arith.constant 0 : index
    %13 = vector.load %arg5[%c0_9, %c0_10] : memref<128x128xbf16, #tpu.memory_space<vmem>>, vector<128x128xbf16>
    %cst_11 = arith.constant dense<0.000000e+00> : vector<64x128xf32>
    %14 = tpu.matmul %12, %13, %cst_11 {dimension_numbers = #tpu.dot_dimension_numbers<[1], [0], [0], [1], [0, 0, 1, 1], [], []>} : vector<64x128xbf16>, vector<128x128xbf16>, vector<64x128xf32> -> vector<64x128xf32>
    %15 = arith.addf %11, %14 : vector<64x128xf32>
    %c0_12 = arith.constant 0 : index
    %c0_13 = arith.constant 0 : index
    %16 = vector.load %arg8[%c0_12, %c0_13] : memref<64x128xf32, #tpu.memory_space<vmem>>, vector<64x128xf32>
    tpu.vector_store %arg8[%c0_12, %c0_13], %15 {strides = array<i32>} : memref<64x128xf32, #tpu.memory_space<vmem>>, vector<64x128xf32>,
    %c2_i32 = arith.constant 2 : i32
    %17 = arith.cmpi eq, %arg1, %c2_i32 : i32
    %18 = arith.extui %17 : i1 to i32
    %c0_i32_14 = arith.constant 0 : i32
    %19 = arith.cmpi ne, %18, %c0_i32_14 : i32
    scf.if %19 {
      %c0_15 = arith.constant 0 : index
      %c0_16 = arith.constant 0 : index
      %20 = vector.load %arg8[%c0_15, %c0_16] : memref<64x128xf32, #tpu.memory_space<vmem>>, vector<64x128xf32>
      %c0_17 = arith.constant 0 : index
      %c0_18 = arith.constant 0 : index
      %21 = vector.load %arg7[%c0_17, %c0_18] : memref<64x128xf32, #tpu.memory_space<vmem>>, vector<64x128xf32>
      tpu.vector_store %arg7[%c0_17, %c0_18], %20 {strides = array<i32>} : memref<64x128xf32, #tpu.memory_space<vmem>>, vector<64x128xf32>,
    } else {
    }
    return
  }
  func.func @transform_0(%arg0: i32, %arg1: i32) -> (i32, i32) {
    %c0_i32 = arith.constant 0 : i32
    %c0_i32_0 = arith.constant 0 : i32
    return %arg0, %c0_i32 : i32, i32
  }
  func.func @transform_1(%arg0: i32, %arg1: i32) -> (i32, i32) {
    %c0_i32 = arith.constant 0 : i32
    %c0_i32_0 = arith.constant 0 : i32
    return %c0_i32, %arg1 : i32, i32
  }
  func.func @transform_2(%arg0: i32, %arg1: i32) -> (i32, i32) {
    %c0_i32 = arith.constant 0 : i32
    %c0_i32_0 = arith.constant 0 : i32
    return %c0_i32, %arg1 : i32, i32
  }
  func.func @transform_3(%arg0: i32, %arg1: i32) -> (i32, i32) {
    %c0_i32 = arith.constant 0 : i32
    %c0_i32_0 = arith.constant 0 : i32
    return %arg1, %c0_i32 : i32, i32
  }
  func.func @transform_4(%arg0: i32, %arg1: i32) -> (i32, i32) {
    %c0_i32 = arith.constant 0 : i32
    %c0_i32_0 = arith.constant 0 : i32
    %c0_i32_1 = arith.constant 0 : i32
    return %c0_i32, %c0_i32_0 : i32, i32
  }
  func.func @transform_5(%arg0: i32, %arg1: i32) -> (i32, i32) {
    %c0_i32 = arith.constant 0 : i32
    %c0_i32_0 = arith.constant 0 : i32
    return %arg0, %c0_i32 : i32, i32
  }
}

</mosaic_0001>

<bundles_post_ra>
// kernel: berrrt_ffn.1
= control target key start
LH: loop header
LB: loop body
LE: loop exit
PB: predicated region body
PF: predicated region fallthrough
CT: control target
= control target key end

     0   :  { %s1317_s0 = inlined_call_operand.vmem [shape: bf16[128,128], index: 0, kind: input, shape index: {}]   ;;  %s1318_s1 = inlined_call_operand.vmem [shape: bf16[128,384], index: 1, kind: input, shape index: {}]   ;;  %s1319_s2 = inlined_call_operand.vmem [shape: f32[1,384], index: 2, kind: input, shape index: {}]   ;;  %s1320_s3 = inlined_call_operand.vmem [shape: bf16[384,128], index: 3, kind: input, shape index: {}]   ;;  %s1321_s4 = inlined_call_operand.vmem [shape: f32[1,128], index: 4, kind: input, shape index: {}]   ;;  %s1322_s5 = inlined_call_operand.vmem [shape: f32[128,128], index: 5, kind: output, shape index: {}]  }
   0x1   :  { %1323 = sst [smem:[#allocation5_spill]] %s1318_s1 }
   0x2   :  { %s1153_s18 = smov 0   ;;  %s1155_s19 = smov 0  }
   0x3   :  { %s1157_s20 = smov 0   ;;  %s1159_s21 = smov 0  }
   0x4   :  { %s1161_s22 = smov 0   ;;  %s1163_s23 = smov 0  }
   0x5   :  { %s1165_s24 = smov 0  }
   0x6 LB: > { %s24_s25 = sadd.s32 1, %s1113_s22  ;;  %s27_s26 = sadd.s32 1, %s1117_s23  ;;  %s1121_s24 = sphi %s1165_s24, %s15_s24   ;;  %s1117_s23 = sphi %s1163_s23, %s1332_s23   ;;  %s1113_s22 = sphi %s1161_s22, %s1331_s22   ;;  %s1109_s21 = sphi %s1159_s21, %s1330_s21   ;;  %s1105_s20 = sphi %s1157_s20, %s1329_s20   ;;  %s1101_s19 = sphi %s1155_s19, %s1328_s19   ;;  %s1097_s18 = sphi %s1153_s18, %s1327_s18  }
   0x7   : > { %p25_p0 = scmp.ge.s32.totalorder %s24_s25, 3  ;;  %s60_s27 = sadd.s32 1, %s1101_s19 }
   0x8   : > { %p67_p1 = scmp.ne.s32.totalorder %s1101_s19, %s1097_s18  ;;  %p68_p2 = scmp.eq.s32.totalorder %s1121_s24, 0 }
   0x9   : > { %s1334_s25 = smov (%p25_p0, %s24_s25), 0  ;;  %s1336_s26 = smov (!%p25_p0, %s27_s26), %s1117_s23 }
   0xa   : > { %s57_s28 = ssub.s32 %s1113_s22, %s1334_s25  ;;  %p69_p3 = por %p68_p2, %p67_p1 }
   0xb   : > { %p29_p4 = scmp.ge.s32.totalorder %s1336_s26, 2  ;;  %p58_p5 = scmp.eq.s32.totalorder %s57_s28, 0 }
   0xc   : > { %p882_p6 = scmp.ge.s32.totalorder %s1121_s24, 6 }
   0xd   : > { %s1338_s26 = smov (%p29_p4, %s1336_s26), 0 }
   0xe   : > { %1324 = sst [smem:[#allocation4_spill]] %s1338_s26  ;;  %195 = sbr.rel (%p882_p6) target bundleno = 39 (0x27), region = 20 }
   0xf   : > { %s1202_s29 = scalar_select %p58_p5, %s1101_s19, %s60_s27  }
  0x13   : > { %207 = sbr.rel (!%p69_p3) target bundleno = 39 (0x27), region = 28  ;;  %s209_s30 = sand.u32 (%p69_p3), 1, %s1101_s19  }
  0x14   : > { %s884_s6 = sshll.u32 (%p69_p3), %s1113_s22, 2  ;;  %s883_s7 = sshll.u32 (%p69_p3), %s209_s30, 6 }
  0x15   : > { %s1325_s1 = sld [smem:[#allocation5_spill]] (%p69_p3)  ;;  %s211_s11 = scalar_lea.vmem (%p69_p3), [#allocation3], %s883_s7 }
  0x1b   : > { %s1210_s10 = scalar_lea.vmem %s1325_s1, %s884_s6 }
  0x1c   : > { %v230_v0 = vld [vmem:[%s1210_s10] sm:$0xf]  ;;  %v232_v1 = vld [vmem:[%s1210_s10 + $0xc] sm:$0xf]  ;;  %v234_v2 = vld [vmem:[%s1210_s10 + $0x18] sm:$0xf] }
  0x1d   : > { %231 = vst [vmem:[%s211_s11] sm:$0xf] %v230_v0  ;;  %233 = vst [vmem:[%s211_s11 + $0x4] sm:$0xf] %v232_v1  ;;  %v236_v3 = vld [vmem:[%s1210_s10 + $0x24] sm:$0xf] }
  0x1e   : > { %v238_v4 = vld [vmem:[%s1210_s10 + $0x30] sm:$0xf]  ;;  %235 = vst [vmem:[%s211_s11 + $0x8] sm:$0xf] %v234_v2  ;;  %237 = vst [vmem:[%s211_s11 + $0xc] sm:$0xf] %v236_v3 }
  0x1f   : > { %239 = vst [vmem:[%s211_s11 + $0x10] sm:$0xf] %v238_v4  ;;  %v240_v5 = vld [vmem:[%s1210_s10 + $0x3c] sm:$0xf]  ;;  %v242_v6 = vld [vmem:[%s1210_s10 + $0x48] sm:$0xf] }
  0x20   : > { %v244_v7 = vld [vmem:[%s1210_s10 + $0x54] sm:$0xf]  ;;  %241 = vst [vmem:[%s211_s11 + $0x14] sm:$0xf] %v240_v5  ;;  %243 = vst [vmem:[%s211_s11 + $0x18] sm:$0xf] %v242_v6 }
  0x21   : > { %245 = vst [vmem:[%s211_s11 + $0x1c] sm:$0xf] %v244_v7  ;;  %v246_v8 = vld [vmem:[%s1210_s10 + $0x60] sm:$0xf]  ;;  %v248_v9 = vld [vmem:[%s1210_s10 + $0x6c] sm:$0xf] }
  0x22   : > { %v250_v10 = vld [vmem:[%s1210_s10 + $0x78] sm:$0xf]  ;;  %247 = vst [vmem:[%s211_s11 + $0x20] sm:$0xf] %v246_v8  ;;  %249 = vst [vmem:[%s211_s11 + $0x24] sm:$0xf] %v248_v9 }
  0x23   : > { %251 = vst [vmem:[%s211_s11 + $0x28] sm:$0xf] %v250_v10  ;;  %v252_v11 = vld [vmem:[%s1210_s10 + $0x84] sm:$0xf]  ;;  %v254_v12 = vld [vmem:[%s1210_s10 + $0x90] sm:$0xf] }
  0x24   : > { %v256_v13 = vld [vmem:[%s1210_s10 + $0x9c] sm:$0xf]  ;;  %253 = vst [vmem:[%s211_s11 + $0x2c] sm:$0xf] %v252_v11  ;;  %255 = vst [vmem:[%s211_s11 + $0x30] sm:$0xf] %v254_v12 }
  0x25   : > { %257 = vst [vmem:[%s211_s11 + $0x34] sm:$0xf] %v256_v13  ;;  %v258_v14 = vld [vmem:[%s1210_s10 + $0xa8] sm:$0xf]  ;;  %v260_v15 = vld [vmem:[%s1210_s10 + $0xb4] sm:$0xf] }
  0x26   : > { %259 = vst [vmem:[%s211_s11 + $0x38] sm:$0xf] %v258_v14  ;;  %261 = vst [vmem:[%s211_s11 + $0x3c] sm:$0xf] %v260_v15 }
  0x27 PF: > { %p885_p7 = scmp.ge.s32.totalorder %s1121_s24, 1  ;;  %p331_p8 = scmp.lt.s32.totalorder %s1121_s24, 7 }
  0x29   : > { %p332_p9 = pnand %p885_p7, %p331_p8 }
  0x2a   : > { %s338_s12 = sand.u32 (!%p332_p9), 1, %s1097_s18   ;;  %s887_s13 = sshll.u32 (!%p332_p9), %s1109_s21, 3 }
  0x2b   : > { %335 = sbr.rel (%p332_p9) target bundleno = 521 (0x209), region = 77  ;;  %s886_s14 = sshll.u32 (!%p332_p9), %s338_s12, 6 }
  0x2c   : > { %p379_p10 = scmp.lt.s32.totalorder (!%p332_p9), %s887_s13, 15  ;;  %p384_p11 = scmp.lt.s32.totalorder (!%p332_p9), %s1105_s20, 2 }
  0x2d   : > { %s889_s17 = sshll.u32 (!%p332_p9), %s1105_s20, 4  ;;  %p893_p13 = scmp.ne.s32.totalorder (!%p332_p9), %s1105_s20, 0 }
  0x2e   : > { %p388_p12 = scmp.lt.s32.totalorder (!%p332_p9), %s889_s17, 47 }
  0x30   : > { %s1340_s13 = smov (!%p379_p10, %s887_s13), 15  ;;  %s1342_s17 = smov (!%p388_p12, %s889_s17), 47 }
  0x31   : > { %s1234_s15 = scalar_select %p384_p11, %s1105_s20, 2 }
  0x32   : > { %s888_s16 = sshll.u32 %s1340_s13, 2  ;;  %s892_s18 = sshll.u32 %s1340_s13, 3 }
  0x33   : > { %s1240_s30 = scalar_lea.vmem %s1317_s0, %s888_s16  ;;  %s386_s8 = scalar_lea.vmem %s1319_s2, %s1234_s15 }
  0x34   : > { %s1249_s10 = scalar_lea.vmem %s1322_s5, %s892_s18  ;;  %s890_s11 = sshll.u32 %s1342_s17, 2 }
  0x35   : > { %s1254_s26 = scalar_lea.vmem %s1320_s3, %s890_s11  ;;  %s1256_s16 = scalar_lea.vmem [#allocation3], %s886_s14 }
  0x36   : > { %403 = sbr.rel (%p893_p13) target bundleno = 64 (0x40), region = 85 }
  0x3b   : > { %v894_v16 = vld [vmem:[%s1321_s4] ss:$0 sm:$0xff] }
  0x3c   : > { %411 = vst [vmem:[#allocation2 + $0x30] sm:$0xff] %v894_v16  ;;  %412 = vst [vmem:[#allocation2] sm:$0xff] %v894_v16 }
  0x3d   : > { %413 = vst [vmem:[#allocation2 + $0x18] sm:$0xff] %v894_v16  ;;  %414 = vst [vmem:[#allocation2 + $0x10] sm:$0xff] %v894_v16 }
  0x3e   : > { %415 = vst [vmem:[#allocation2 + $0x8] sm:$0xff] %v894_v16  ;;  %416 = vst [vmem:[#allocation2 + $0x20] sm:$0xff] %v894_v16 }
  0x3f   : > { %417 = vst [vmem:[#allocation2 + $0x28] sm:$0xff] %v894_v16  ;;  %418 = vst [vmem:[#allocation2 + $0x38] sm:$0xff] %v894_v16 }
  0x40 PF: > { %v1047_v17 = vld [vmem:[%s1256_s16 + $0x38] sm:$0xff]   ;;  %v1048_v18 = vld [vmem:[%s1256_s16 + $0x30] sm:$0xff]   ;;  %v1049_v19 = vld [vmem:[%s1256_s16 + $0x28] sm:$0xff]   ;;  %p916_p0 = scmp.ne.s32.totalorder %s1105_s20, 2 }
  0x41   : > { %943 = vmatprep.subr.bf16.mxu0 %v1047_v17  ;;  %v1050_v20 = vld [vmem:[%s1256_s16 + $0x20] sm:$0xff]   ;;  %v1051_v22 = vld [vmem:[%s1256_s16 + $0x18] sm:$0xff]   ;;  %v1060_v24 = vld [vmem:[%s1254_s26 + $0x30] sm:$0xff]  }
  0x42   : > { %944 = vmatpush3.bf16.msra.mxu0 %v1047_v17  ;;  %v1055_v21 = vld [vmem:[%s1240_s30] sm:$0xff]   ;;  %v1059_v23 = vld [vmem:[%s1254_s26 + $0x38] sm:$0xff]   ;;  %v1052_v25 = vld [vmem:[%s1256_s16 + $0x10] sm:$0xff]  }
  0x43   : > { %945 = vmatprep.subr.bf16.mxu0 %v1048_v18  ;;  %959 = vmatprep.mubr.bf16.mxu0 %v1055_v21  ;;  %v1061_v26 = vld [vmem:[%s1254_s26 + $0x28] sm:$0xff]   ;;  %v1062_v28 = vld [vmem:[%s1254_s26 + $0x20] sm:$0xff]   ;;  %v1063_v30 = vld [vmem:[%s1254_s26 + $0x18] sm:$0xff]  }
  0x44   : > { %967 = vmatprep.subr.bf16.mxu1 %v1059_v23  ;;  %v1053_v27 = vld [vmem:[%s1256_s16 + $0x8] sm:$0xff]   ;;  %v1054_v29 = vld [vmem:[%s1256_s16] sm:$0xff]   ;;  %v1057_v32 = vld [vmem:[%s1240_s30 + $0x10] sm:$0xff]  }
  0x45   : > { %968 = vmatpush3.bf16.msra.mxu1 %v1059_v23  ;;  %v1056_v31 = vld [vmem:[%s1240_s30 + $0x8] sm:$0xff]   ;;  %v1058_v33 = vld [vmem:[%s1240_s30 + $0x18] sm:$0xff]   ;;  %v1064_v34 = vld [vmem:[%s1254_s26 + $0x10] sm:$0xff]  }
  0x46   : > { %946 = vmatpush3.bf16.msra.mxu0 %v1048_v18  ;;  %969 = vmatprep.subr.bf16.mxu1 %v1060_v24  ;;  %v1065_v35 = vld [vmem:[%s1254_s26 + $0x8] sm:$0xff]   ;;  %v1066_v36 = vld [vmem:[%s1254_s26] sm:$0xff]   ;;  %v597_v2 = vld [vmem:[#allocation2 + $0x18] sm:$0xff] }
  0x47   : > { %947 = vmatprep.subr.bf16.mxu0 %v1049_v19  ;;  %v895_v39 = vld [vmem:[%s386_s8] ss:$0 sm:$0xff]  ;;  %v595_v4 = vld [vmem:[#allocation2 + $0x30] sm:$0xff]  ;;  %v601_v13 = vld [vmem:[#allocation2 + $0x28] sm:$0xff] }
  0x48   : > { %v598_v7 = vld [vmem:[#allocation2 + $0x10] sm:$0xff]  ;;  %v596_v10 = vld [vmem:[#allocation2] sm:$0xff]  ;;  %v599_v16 = vld [vmem:[#allocation2 + $0x8] sm:$0xff] }
  0x49   : > { %970 = vmatpush3.bf16.msra.mxu1 %v1060_v24 }
  0x4a   : > { %948 = vmatpush3.bf16.msra.mxu0 %v1049_v19  ;;  %971 = vmatprep.subr.bf16.mxu1 %v1061_v26  ;;  %v602_v19 = vld [vmem:[#allocation2 + $0x38] sm:$0xff] }
  0x4b   : > { %949 = vmatprep.subr.bf16.mxu0 %v1050_v20 }
  0x4d   : > { %972 = vmatpush3.bf16.msra.mxu1 %v1061_v26 }
  0x4e   : > { %950 = vmatpush3.bf16.msra.mxu0 %v1050_v20  ;;  %973 = vmatprep.subr.bf16.mxu1 %v1062_v28 }
  0x4f   : > { %951 = vmatprep.subr.bf16.mxu0 %v1051_v22 }
  0x51   : > { %974 = vmatpush3.bf16.msra.mxu1 %v1062_v28 }
  0x52   : > { %952 = vmatpush3.bf16.msra.mxu0 %v1051_v22  ;;  %975 = vmatprep.subr.bf16.mxu1 %v1063_v30  ;;  %v600_v22 = vld [vmem:[#allocation2 + $0x20] sm:$0xff] }
  0x53   : > { %953 = vmatprep.subr.bf16.mxu0 %v1052_v25 }
  0x55   : > { %976 = vmatpush3.bf16.msra.mxu1 %v1063_v30 }
  0x56   : > { %954 = vmatpush3.bf16.msra.mxu0 %v1052_v25  ;;  %977 = vmatprep.subr.bf16.mxu1 %v1064_v34 }
  0x57   : > { %955 = vmatprep.subr.bf16.mxu0 %v1053_v27 }
  0x59   : > { %978 = vmatpush3.bf16.msra.mxu1 %v1064_v34 }
  0x5a   : > { %956 = vmatpush3.bf16.msra.mxu0 %v1053_v27  ;;  %979 = vmatprep.subr.bf16.mxu1 %v1065_v35 }
  0x5b   : > { %957 = vmatprep.subr.bf16.mxu0 %v1054_v29 }
  0x5d   : > { %980 = vmatpush3.bf16.msra.mxu1 %v1065_v35 }
  0x5e   : > { %958 = vmatpush3.bf16.msra.mxu0 %v1054_v29  ;;  %981 = vmatprep.subr.bf16.mxu1 %v1066_v36 }
  0x61   : > { %960 = vmatmul.mubr.bf16.vlgmr.msra.gmra.mxu0 %v1056_v31  ;;  %982 = vmatpush3.bf16.msra.mxu1 %v1066_v36 }
  0x62   : > { %963 = vmatprep.mubr.bf16.mxu0 %v1057_v32 }
  0x69   : > { %964 = vmatmul.mubr.bf16.gmra.mxu0 %v1058_v33 }
 0x121   : > { %v961_v37 = vpop.f32.mrf.mxu0 }
 0x122   : > { %v565_v43 = vadd.f32 %v961_v37, %v895_v39 }
 0x123   : > { %v556_v38 = vpop.f32.mrf.mxu0 }
 0x124   : > { %v557_v41 = vadd.f32 %v895_v39, %v556_v38  ;;  %v589_v50 = vmax.f32 %v565_v43, 0.0 }
 0x125   : > { %v962_v40 = vpop.f32.mrf.mxu0 }
 0x126   : > { %v568_v42 = vadd.f32 %v962_v40, %v895_v39  ;;  %v587_v48 = vmax.f32 %v557_v41, 0.0 }
 0x127   : > { %v559_v44 = vpop.f32.mrf.mxu0 }
 0x128   : > { %v560_v45 = vadd.f32 %v895_v39, %v559_v44  ;;  %v590_v46 = vmax.f32 %v568_v42, 0.0 }
 0x129   : > { %v965_v47 = vpop.f32.mrf.mxu0 }
 0x12a   : > { %v588_v49 = vmax.f32 %v560_v45, 0.0  ;;  %v604_v53 = vpack.c.bf16 %v590_v46, %v589_v50  ;;  %v581_v57 = vadd.f32 %v965_v47, %v895_v39 }
 0x12b   : > { %v572_v51 = vpop.f32.mrf.mxu0 }
 0x12c   : > { %v603_v52 = vpack.c.bf16 %v588_v49, %v587_v48  ;;  %v573_v55 = vadd.f32 %v895_v39, %v572_v51  ;;  %v593_v63 = vmax.f32 %v581_v57, 0.0 }
 0x12d   : > { %v966_v54 = vpop.f32.mrf.mxu0 }
 0x12e   : > { %v584_v56 = vadd.f32 %v966_v54, %v895_v39  ;;  %983 = vmatprep.mubr.bf16.mxu1 %v603_v52  ;;  %v591_v61 = vmax.f32 %v573_v55, 0.0 }
 0x12f   : > { %v575_v58 = vpop.f32.mrf.mxu0  ;;  %984 = vmatmul.mubr.bf16.vlgmr.msra.gmra.mxu1 %v604_v53 }
 0x130   : > { %v576_v59 = vadd.f32 %v895_v39, %v575_v58  ;;  %v594_v60 = vmax.f32 %v584_v56, 0.0 }
 0x132   : > { %v592_v62 = vmax.f32 %v576_v59, 0.0  ;;  %v606_v1 = vpack.c.bf16 %v594_v60, %v593_v63 }
 0x134   : > { %v605_v0 = vpack.c.bf16 %v592_v62, %v591_v61 }
 0x136   : > { %987 = vmatprep.mubr.bf16.mxu1 %v605_v0 }
 0x137   : > { %988 = vmatmul.mubr.bf16.gmra.mxu1 %v606_v1 }
 0x1ef   : > { %v985_v3 = vpop.f32.mrf.mxu1 }
 0x1f0   : > { %v738_v5 = vadd.f32 %v985_v3, %v597_v2 }
 0x1f1   : > { %v705_v6 = vpop.f32.mrf.mxu1 }
 0x1f2   : > { %746 = vst [vmem:[#allocation2 + $0x18] sm:$0xff] %v738_v5  ;;  %v736_v8 = vadd.f32 %v705_v6, %v595_v4 }
 0x1f3   : > { %v986_v9 = vpop.f32.mrf.mxu1 }
 0x1f4   : > { %744 = vst [vmem:[#allocation2 + $0x30] sm:$0xff] %v736_v8  ;;  %v739_v11 = vadd.f32 %v986_v9, %v598_v7 }
 0x1f5   : > { %v708_v12 = vpop.f32.mrf.mxu1 }
 0x1f6   : > { %747 = vst [vmem:[#allocation2 + $0x10] sm:$0xff] %v739_v11  ;;  %v737_v14 = vadd.f32 %v708_v12, %v596_v10 }
 0x1f7   : > { %v989_v15 = vpop.f32.mrf.mxu1 }
 0x1f8   : > { %745 = vst [vmem:[#allocation2] sm:$0xff] %v737_v14  ;;  %v742_v17 = vadd.f32 %v989_v15, %v601_v13 }
 0x1f9   : > { %v721_v18 = vpop.f32.mrf.mxu1 }
 0x1fa   : > { %750 = vst [vmem:[#allocation2 + $0x28] sm:$0xff] %v742_v17  ;;  %v740_v20 = vadd.f32 %v721_v18, %v599_v16 }
 0x1fb   : > { %v990_v21 = vpop.f32.mrf.mxu1 }
 0x1fc   : > { %748 = vst [vmem:[#allocation2 + $0x8] sm:$0xff] %v740_v20  ;;  %v743_v23 = vadd.f32 %v990_v21, %v602_v19  ;;  %755 = sbr.rel (%p916_p0) target bundleno = 521 (0x209), region = 89 }
 0x1fd   : > { %v724_v24 = vpop.f32.mrf.mxu1 }
 0x1fe   : > { %751 = vst [vmem:[#allocation2 + $0x38] sm:$0xff] %v743_v23  ;;  %v741_v25 = vadd.f32 %v724_v24, %v600_v22 }
 0x200   : > { %749 = vst [vmem:[#allocation2 + $0x20] sm:$0xff] %v741_v25 }
 0x201   : > { %v756_v26 = vld [vmem:[#allocation2 + $0x30] sm:$0xff]  ;;  %v757_v27 = vld [vmem:[#allocation2] sm:$0xff]  ;;  %v758_v28 = vld [vmem:[#allocation2 + $0x18] sm:$0xff] }
 0x202   : > { %764 = vst [vmem:[%s1249_s10] sm:$0xff] %v756_v26  ;;  %765 = vst [vmem:[%s1249_s10 + $0x8] sm:$0xff] %v757_v27  ;;  %v759_v29 = vld [vmem:[#allocation2 + $0x10] sm:$0xff]  ;;  %v762_v32 = vld [vmem:[#allocation2 + $0x28] sm:$0xff] }
 0x203   : > { %766 = vst [vmem:[%s1249_s10 + $0x10] sm:$0xff] %v758_v28  ;;  %v760_v30 = vld [vmem:[#allocation2 + $0x8] sm:$0xff]  ;;  %767 = vst [vmem:[%s1249_s10 + $0x18] sm:$0xff] %v759_v29 }
 0x204   : > { %768 = vst [vmem:[%s1249_s10 + $0x20] sm:$0xff] %v760_v30  ;;  %770 = vst [vmem:[%s1249_s10 + $0x30] sm:$0xff] %v762_v32 }
 0x205   : > { %v763_v33 = vld [vmem:[#allocation2 + $0x38] sm:$0xff] }
 0x206   : > { %771 = vst [vmem:[%s1249_s10 + $0x38] sm:$0xff] %v763_v33 }
 0x207   : > { %v761_v31 = vld [vmem:[#allocation2 + $0x20] sm:$0xff] }
 0x208   : > { %769 = vst [vmem:[%s1249_s10 + $0x28] sm:$0xff] %v761_v31 }
 0x209 PF: > { %s15_s24 = sadd.s32 1, %s1121_s24   ;;  %s1326_s26 = sld [smem:[#allocation4_spill]] }
 0x20a   : > { %p12_p1 = scmp.ge.s32.totalorder %s15_s24, 8   ;;  %s1327_s18 = smov %s1101_s19 }
 0x20b   : > { %s1328_s19 = smov %s1202_s29  ;;  %s1329_s20 = smov %s1113_s22 }
 0x20c   : > { %s1330_s21 = smov %s1117_s23  ;;  %s1331_s22 = smov %s1334_s25 }
 0x20d   :  { %14 = sbr.rel (!%p12_p1) target bundleno = 6 (0x6), region = 133 }
 0x20f   : > { %s1332_s23 = smov %s1326_s26 }

</bundles_post_ra>
